<compile_context>
chip_gen: v7x
topology: tpu7x:2x2x1
jax: 0.10.0
libtpu: 0.0.40
codegen_flags: <defaults>
</compile_context>

<pallas_src>
import functools

import jax
import jax.numpy as jnp
import numpy as np
from jax.experimental import pallas as pl
from jax.experimental.pallas import tpu as pltpu

EPS = 1e-5
LANE = 128


def _round_up(x, m):
    return ((x + m - 1) // m) * m


# ----------------------------- Pallas kernels ------------------------------

def conv_stats_kernel(w_ref, p_ref, y_ref, sum_ref, ssq_ref):
    """Conv tile (transposed layout) + fused per-lane BN partial statistics.

    w_ref:   (Cout, K)   bf16   (constant block)
    p_ref:   (K, TM)     bf16   (im2col patches, M tile in the lane dim)
    y_ref:   (Cout, TM)  f32    conv output tile (lane-dense store)
    sum_ref: (Cout, TM)  f32    resident accumulator (same block for every i)
    ssq_ref: (Cout, TM)  f32    resident accumulator (same block for every i)
    """
    i = pl.program_id(0)
    y = jnp.dot(w_ref[...], p_ref[...], preferred_element_type=jnp.float32)
    y_ref[...] = y

    @pl.when(i == 0)
    def _():
        sum_ref[...] = jnp.zeros_like(sum_ref)
        ssq_ref[...] = jnp.zeros_like(ssq_ref)

    sum_ref[...] += y
    ssq_ref[...] += y * y


def bn_apply_kernel(y_ref, scale_ref, shift_ref, o_ref):
    """Apply per-channel affine normalization: o = y * scale + shift.

    y_ref/o_ref:         (Cout, TM) f32  (lane-dense)
    scale_ref/shift_ref: (Cout, TM) f32  (pre-broadcast, constant block)
    """
    o_ref[...] = y_ref[...] * scale_ref[...] + shift_ref[...]


# ------------------------------ JAX glue ------------------------------------

def _im2col_kxm(x_nchw, kh, kw, stride, padding, dilation, dtype):
    """Return patches of shape (K, M), K = kh*kw*Cin ordered ((i*kw+j)*Cin+c),
    M = N*Ho*Wo ordered (n, ho, wo)."""
    N, C, H, W = x_nchw.shape
    x_nhwc = jnp.transpose(x_nchw, (0, 2, 3, 1)).astype(dtype)
    x_pad = jnp.pad(x_nhwc, ((0, 0), (padding, padding), (padding, padding), (0, 0)))
    Ho = (H + 2 * padding - dilation * (kh - 1) - 1) // stride + 1
    Wo = (W + 2 * padding - dilation * (kw - 1) - 1) // stride + 1
    taps = []
    for i in range(kh):
        for j in range(kw):
            hs, ws = i * dilation, j * dilation
            taps.append(x_pad[:, hs:hs + stride * Ho:stride,
                              ws:ws + stride * Wo:stride, :])   # (N, Ho, Wo, Cin)
    col = jnp.stack(taps, axis=0)                # (kh*kw, N, Ho, Wo, Cin)
    col = jnp.transpose(col, (0, 4, 1, 2, 3))    # (kh*kw, Cin, N, Ho, Wo)
    return col.reshape(kh * kw * C, N * Ho * Wo), Ho, Wo


@functools.partial(jax.jit, static_argnames=("stride", "padding", "dilation"))
def conv2d_batchnorm(x_nchw, weight, bias, gamma, beta, *,
                     stride, padding, dilation):
    """Forward of conv2DBatchNorm.  x_nchw: (N, Cin, H, W) -> (N, Cout, Ho, Wo)."""
    Cout, Cin, kh, kw = weight.shape
    N = x_nchw.shape[0]

    # Conv bias is mathematically cancelled by the training-mode BatchNorm
    # mean subtraction -> not used in the compute path.
    del bias

    patches, Ho, Wo = _im2col_kxm(x_nchw, kh, kw, stride, padding, dilation,
                                  jnp.bfloat16)
    K, M = patches.shape

    # Lane-dense M tiles, as large as reasonable (amortize per-step overhead).
    TM = min(1024, _round_up(M, LANE))
    M_pad = _round_up(M, TM)
    grid_m = M_pad // TM
    patches = jnp.pad(patches, ((0, 0), (0, M_pad - M)))

    # Weight -> (Cout, K) matching the patch ordering ((i*kw + j)*Cin + c).
    w_mat = jnp.transpose(weight, (0, 2, 3, 1)).reshape(Cout, K).astype(jnp.bfloat16)

    # --- Pass 1: conv (MXU) + fused per-lane BN partial sums -----------------
    y, psum, pssq = pl.pallas_call(
        conv_stats_kernel,
        out_shape=(jax.ShapeDtypeStruct((Cout, M_pad), jnp.float32),
                   jax.ShapeDtypeStruct((Cout, TM), jnp.float32),
                   jax.ShapeDtypeStruct((Cout, TM), jnp.float32)),
        grid_spec=pltpu.PrefetchScalarGridSpec(
            num_scalar_prefetch=0,
            grid=(grid_m,),
            in_specs=[pl.BlockSpec((Cout, K), lambda i: (0, 0)),
                      pl.BlockSpec((K, TM), lambda i: (0, i))],
            out_specs=[pl.BlockSpec((Cout, TM), lambda i: (0, i)),
                       pl.BlockSpec((Cout, TM), lambda i: (0, 0)),   # resident
                       pl.BlockSpec((Cout, TM), lambda i: (0, 0))],  # resident
        ),
        compiler_params=pltpu.CompilerParams(
            dimension_semantics=("arbitrary",)),   # stats accumulate across M
    )(w_mat, patches)

    # --- Tiny finish of mean / biased var in plain JAX (f32) ------------------
    # Padded columns contribute zeros (no bias), so no masking is needed.
    cnt = jnp.float32(M)
    mean = jnp.sum(psum, axis=1) / cnt                              # (Cout,)
    var = jnp.maximum(jnp.sum(pssq, axis=1) / cnt - mean * mean, 0.0)
    scale = gamma.astype(jnp.float32) * jax.lax.rsqrt(var + EPS)    # (Cout,)
    shift = beta.astype(jnp.float32) - mean * scale                 # (Cout,)
    scale_b = jnp.broadcast_to(scale[:, None], (Cout, TM))
    shift_b = jnp.broadcast_to(shift[:, None], (Cout, TM))

    # --- Pass 2: tiled, pipelined normalize (lane-dense stores) --------------
    y_bn = pl.pallas_call(
        bn_apply_kernel,
        out_shape=jax.ShapeDtypeStruct((Cout, M_pad), jnp.float32),
        grid_spec=pltpu.PrefetchScalarGridSpec(
            num_scalar_prefetch=0,
            grid=(grid_m,),
            in_specs=[pl.BlockSpec((Cout, TM), lambda i: (0, i)),
                      pl.BlockSpec((Cout, TM), lambda i: (0, 0)),
                      pl.BlockSpec((Cout, TM), lambda i: (0, 0))],
            out_specs=pl.BlockSpec((Cout, TM), lambda i: (0, i)),
        ),
        compiler_params=pltpu.CompilerParams(
            dimension_semantics=("parallel",)),
    )(y, scale_b, shift_b)

    # (Cout, M) -> (Cout, N, Ho, Wo) -> NCHW
    out = y_bn[:, :M].reshape(Cout, N, Ho, Wo)
    return jnp.transpose(out, (1, 0, 2, 3))


# ------------------------------ reference -----------------------------------

def reference(x_nchw, weight, bias, gamma, beta, *, stride, padding, dilation):
    y = jax.lax.conv_general_dilated(
        x_nchw, weight, window_strides=(stride, stride),
        padding=[(padding, padding), (padding, padding)],
        rhs_dilation=(dilation, dilation),
        dimension_numbers=("NCHW", "OIHW", "NCHW"),
        precision=jax.lax.Precision.HIGHEST)
    y = y + bias[None, :, None, None]
    mean = y.mean(axis=(0, 2, 3), keepdims=True)
    var = ((y - mean) ** 2).mean(axis=(0, 2, 3), keepdims=True)  # biased var
    return (y - mean) / jnp.sqrt(var + EPS) * gamma[None, :, None, None] \
        + beta[None, :, None, None]


# --------------------------------- main --------------------------------------

if __name__ == "__main__":
    # Module config (conv2DBatchNorm(in, out, k, stride, padding, dilation, bias))
    in_channels, out_channels = 4, 8
    kernel_size, stride, padding, dilation = 3, 1, 1, 1
    use_bias = False

    key = jax.random.PRNGKey(0)
    kx, kwt, kb = jax.random.split(key, 3)

    # Input: NCHW, small shapes.
    x = jax.random.normal(kx, (2, in_channels, 16, 16), dtype=jnp.float32)

    # Deterministic parameter init (Kaiming-uniform-like for conv).
    fan_in = in_channels * kernel_size * kernel_size
    bound = 1.0 / np.sqrt(fan_in)
    weight = jax.random.uniform(
        kwt, (out_channels, in_channels, kernel_size, kernel_size),
        minval=-bound, maxval=bound, dtype=jnp.float32)
    bias = (jax.random.uniform(kb, (out_channels,), minval=-bound, maxval=bound,
                               dtype=jnp.float32)
            if use_bias else jnp.zeros((out_channels,), jnp.float32))
    gamma = jnp.ones((out_channels,), jnp.float32)   # BatchNorm2d default weight
    beta = jnp.zeros((out_channels,), jnp.float32)   # BatchNorm2d default bias

    out = conv2d_batchnorm(x, weight, bias, gamma, beta,
                           stride=stride, padding=padding, dilation=dilation)
    out = jax.block_until_ready(out)

    ref = reference(x, weight, bias, gamma, beta,
                    stride=stride, padding=padding, dilation=dilation)

    assert out.shape == ref.shape, (out.shape, ref.shape)
    np.testing.assert_allclose(np.asarray(out), np.asarray(ref),
                               atol=2e-2, rtol=2e-2)
    print("KERNEL_OK")
</pallas_src>

<mosaic_0001>
module attributes {stable_mosaic.version = 11 : i64} {
  func.func @conv_stats_kernel(%arg0: i32, %arg1: memref<8x36xbf16, #tpu.memory_space<vmem>>, %arg2: memref<36x512xbf16, #tpu.memory_space<vmem>>, %arg3: memref<8x512xf32, #tpu.memory_space<vmem>>, %arg4: memref<8x512xf32, #tpu.memory_space<vmem>>, %arg5: memref<8x512xf32, #tpu.memory_space<vmem>>) attributes {dimension_semantics = [#tpu.dimension_semantics<arbitrary>], iteration_bounds = array<i64: 1>, scalar_prefetch = 0 : i64, scratch_operands = 0 : i64, tpu.core_type = #tpu.core_type<tc>, window_params = [{pipeline_mode = #tpu.pipeline_mode<synchronous>, transform_indices = @transform_0, window_bounds = array<i64: 8, 36>}, {transform_indices = @transform_1, window_bounds = array<i64: 36, 512>}, {transform_indices = @transform_2, window_bounds = array<i64: 8, 512>}, {pipeline_mode = #tpu.pipeline_mode<synchronous>, transform_indices = @transform_3, window_bounds = array<i64: 8, 512>}, {pipeline_mode = #tpu.pipeline_mode<synchronous>, transform_indices = @transform_4, window_bounds = array<i64: 8, 512>}]} {
    %c0 = arith.constant 0 : index
    %c0_0 = arith.constant 0 : index
    %0 = vector.load %arg1[%c0, %c0_0] : memref<8x36xbf16, #tpu.memory_space<vmem>>, vector<8x36xbf16>
    %c0_1 = arith.constant 0 : index
    %c0_2 = arith.constant 0 : index
    %1 = vector.load %arg2[%c0_1, %c0_2] : memref<36x512xbf16, #tpu.memory_space<vmem>>, vector<36x512xbf16>
    %cst = arith.constant dense<0.000000e+00> : vector<8x512xf32>
    %2 = tpu.matmul %0, %1, %cst {dimension_numbers = #tpu.dot_dimension_numbers<[1], [0], [0], [1], [0, 0, 1, 1], [], []>} : vector<8x36xbf16>, vector<36x512xbf16>, vector<8x512xf32> -> vector<8x512xf32>
    %c0_3 = arith.constant 0 : index
    %c0_4 = arith.constant 0 : index
    %3 = vector.load %arg3[%c0_3, %c0_4] : memref<8x512xf32, #tpu.memory_space<vmem>>, vector<8x512xf32>
    tpu.vector_store %arg3[%c0_3, %c0_4], %2 {strides = array<i32>} : memref<8x512xf32, #tpu.memory_space<vmem>>, vector<8x512xf32>,
    %c0_i32 = arith.constant 0 : i32
    %4 = arith.cmpi eq, %arg0, %c0_i32 : i32
    %5 = arith.extui %4 : i1 to i32
    %c0_i32_5 = arith.constant 0 : i32
    %6 = arith.cmpi ne, %5, %c0_i32_5 : i32
    scf.if %6 {
      %cst_14 = arith.constant 0.000000e+00 : f32
      %14 = vector.broadcast %cst_14 : f32 to vector<8x512xf32>
      %c0_15 = arith.constant 0 : index
      %c0_16 = arith.constant 0 : index
      %15 = vector.load %arg4[%c0_15, %c0_16] : memref<8x512xf32, #tpu.memory_space<vmem>>, vector<8x512xf32>
      tpu.vector_store %arg4[%c0_15, %c0_16], %14 {strides = array<i32>} : memref<8x512xf32, #tpu.memory_space<vmem>>, vector<8x512xf32>,
      %cst_17 = arith.constant 0.000000e+00 : f32
      %16 = vector.broadcast %cst_17 : f32 to vector<8x512xf32>
      %c0_18 = arith.constant 0 : index
      %c0_19 = arith.constant 0 : index
      %17 = vector.load %arg5[%c0_18, %c0_19] : memref<8x512xf32, #tpu.memory_space<vmem>>, vector<8x512xf32>
      tpu.vector_store %arg5[%c0_18, %c0_19], %16 {strides = array<i32>} : memref<8x512xf32, #tpu.memory_space<vmem>>, vector<8x512xf32>,
    } else {
    }
    %c0_6 = arith.constant 0 : index
    %c0_7 = arith.constant 0 : index
    %7 = vector.load %arg4[%c0_6, %c0_7] : memref<8x512xf32, #tpu.memory_space<vmem>>, vector<8x512xf32>
    %8 = arith.addf %7, %2 : vector<8x512xf32>
    %c0_8 = arith.constant 0 : index
    %c0_9 = arith.constant 0 : index
    %9 = vector.load %arg4[%c0_8, %c0_9] : memref<8x512xf32, #tpu.memory_space<vmem>>, vector<8x512xf32>
    tpu.vector_store %arg4[%c0_8, %c0_9], %8 {strides = array<i32>} : memref<8x512xf32, #tpu.memory_space<vmem>>, vector<8x512xf32>,
    %c0_10 = arith.constant 0 : index
    %c0_11 = arith.constant 0 : index
    %10 = vector.load %arg5[%c0_10, %c0_11] : memref<8x512xf32, #tpu.memory_space<vmem>>, vector<8x512xf32>
    %11 = arith.mulf %2, %2 : vector<8x512xf32>
    %12 = arith.addf %10, %11 : vector<8x512xf32>
    %c0_12 = arith.constant 0 : index
    %c0_13 = arith.constant 0 : index
    %13 = vector.load %arg5[%c0_12, %c0_13] : memref<8x512xf32, #tpu.memory_space<vmem>>, vector<8x512xf32>
    tpu.vector_store %arg5[%c0_12, %c0_13], %12 {strides = array<i32>} : memref<8x512xf32, #tpu.memory_space<vmem>>, vector<8x512xf32>,
    return
  }
  func.func @transform_0(%arg0: i32) -> (i32, i32) {
    %c0_i32 = arith.constant 0 : i32
    %c0_i32_0 = arith.constant 0 : i32
    %c0_i32_1 = arith.constant 0 : i32
    return %c0_i32, %c0_i32_0 : i32, i32
  }
  func.func @transform_1(%arg0: i32) -> (i32, i32) {
    %c0_i32 = arith.constant 0 : i32
    %c0_i32_0 = arith.constant 0 : i32
    return %c0_i32, %arg0 : i32, i32
  }
  func.func @transform_2(%arg0: i32) -> (i32, i32) {
    %c0_i32 = arith.constant 0 : i32
    %c0_i32_0 = arith.constant 0 : i32
    return %c0_i32, %arg0 : i32, i32
  }
  func.func @transform_3(%arg0: i32) -> (i32, i32) {
    %c0_i32 = arith.constant 0 : i32
    %c0_i32_0 = arith.constant 0 : i32
    %c0_i32_1 = arith.constant 0 : i32
    return %c0_i32, %c0_i32_0 : i32, i32
  }
  func.func @transform_4(%arg0: i32) -> (i32, i32) {
    %c0_i32 = arith.constant 0 : i32
    %c0_i32_0 = arith.constant 0 : i32
    %c0_i32_1 = arith.constant 0 : i32
    return %c0_i32, %c0_i32_0 : i32, i32
  }
}

module attributes {stable_mosaic.version = 11 : i64} {
  func.func @bn_apply_kernel(%arg0: i32, %arg1: memref<8x512xf32, #tpu.memory_space<vmem>>, %arg2: memref<8x512xf32, #tpu.memory_space<vmem>>, %arg3: memref<8x512xf32, #tpu.memory_space<vmem>>, %arg4: memref<8x512xf32, #tpu.memory_space<vmem>>) attributes {dimension_semantics = [#tpu.dimension_semantics<parallel>], iteration_bounds = array<i64: 1>, scalar_prefetch = 0 : i64, scratch_operands = 0 : i64, tpu.core_type = #tpu.core_type<tc>, window_params = [{transform_indices = @transform_0, window_bounds = array<i64: 8, 512>}, {pipeline_mode = #tpu.pipeline_mode<synchronous>, transform_indices = @transform_1, window_bounds = array<i64: 8, 512>}, {pipeline_mode = #tpu.pipeline_mode<synchronous>, transform_indices = @transform_2, window_bounds = array<i64: 8, 512>}, {transform_indices = @transform_3, window_bounds = array<i64: 8, 512>}]} {
    %c0 = arith.constant 0 : index
    %c0_0 = arith.constant 0 : index
    %0 = vector.load %arg1[%c0, %c0_0] : memref<8x512xf32, #tpu.memory_space<vmem>>, vector<8x512xf32>
    %c0_1 = arith.constant 0 : index
    %c0_2 = arith.constant 0 : index
    %1 = vector.load %arg2[%c0_1, %c0_2] : memref<8x512xf32, #tpu.memory_space<vmem>>, vector<8x512xf32>
    %2 = arith.mulf %0, %1 : vector<8x512xf32>
    %c0_3 = arith.constant 0 : index
    %c0_4 = arith.constant 0 : index
    %3 = vector.load %arg3[%c0_3, %c0_4] : memref<8x512xf32, #tpu.memory_space<vmem>>, vector<8x512xf32>
    %4 = arith.addf %2, %3 : vector<8x512xf32>
    %c0_5 = arith.constant 0 : index
    %c0_6 = arith.constant 0 : index
    %5 = vector.load %arg4[%c0_5, %c0_6] : memref<8x512xf32, #tpu.memory_space<vmem>>, vector<8x512xf32>
    tpu.vector_store %arg4[%c0_5, %c0_6], %4 {strides = array<i32>} : memref<8x512xf32, #tpu.memory_space<vmem>>, vector<8x512xf32>,
    return
  }
  func.func @transform_0(%arg0: i32) -> (i32, i32) {
    %c0_i32 = arith.constant 0 : i32
    %c0_i32_0 = arith.constant 0 : i32
    return %c0_i32, %arg0 : i32, i32
  }
  func.func @transform_1(%arg0: i32) -> (i32, i32) {
    %c0_i32 = arith.constant 0 : i32
    %c0_i32_0 = arith.constant 0 : i32
    %c0_i32_1 = arith.constant 0 : i32
    return %c0_i32, %c0_i32_0 : i32, i32
  }
  func.func @transform_2(%arg0: i32) -> (i32, i32) {
    %c0_i32 = arith.constant 0 : i32
    %c0_i32_0 = arith.constant 0 : i32
    %c0_i32_1 = arith.constant 0 : i32
    return %c0_i32, %c0_i32_0 : i32, i32
  }
  func.func @transform_3(%arg0: i32) -> (i32, i32) {
    %c0_i32 = arith.constant 0 : i32
    %c0_i32_0 = arith.constant 0 : i32
    return %c0_i32, %arg0 : i32, i32
  }
}

</mosaic_0001>

<bundles_post_ra>
// kernel: conv2d_batchnorm.3
= control target key start
LH: loop header
LB: loop body
LE: loop exit
PB: predicated region body
PF: predicated region fallthrough
CT: control target
= control target key end

     0   :  { %s110_s0 = inlined_call_operand.vmem [shape: f32[8,512], index: 0, kind: input, shape index: {}]   ;;  %s111_s1 = inlined_call_operand.vmem [shape: f32[8,512], index: 1, kind: input, shape index: {}]   ;;  %s112_s2 = inlined_call_operand.vmem [shape: f32[8,512], index: 2, kind: input, shape index: {}]   ;;  %s113_s3 = inlined_call_operand.vmem [shape: f32[8,512], index: 3, kind: output, shape index: {}]  }
   0x1   :  { %v14_v0 = vld [vmem:[%s110_s0] sm:$0xff]  ;;  %v15_v4 = vld [vmem:[%s110_s0 + $0x8] sm:$0xff]  ;;  %v16_v8 = vld [vmem:[%s110_s0 + $0x10] sm:$0xff] }
   0x2   :  { %v18_v1 = vld [vmem:[%s111_s1] sm:$0xff]  ;;  %v19_v5 = vld [vmem:[%s111_s1 + $0x8] sm:$0xff]  ;;  %v20_v9 = vld [vmem:[%s111_s1 + $0x10] sm:$0xff] }
   0x3   :  { %v26_v2 = vld [vmem:[%s112_s2] sm:$0xff]  ;;  %v22_v3 = vmul.f32 %v18_v1, %v14_v0  ;;  %v27_v6 = vld [vmem:[%s112_s2 + $0x8] sm:$0xff]  ;;  %v23_v7 = vmul.f32 %v19_v5, %v15_v4  ;;  %v28_v10 = vld [vmem:[%s112_s2 + $0x10] sm:$0xff]  ;;  %v24_v12 = vmul.f32 %v20_v9, %v16_v8 }
   0x4   :  { %v17_v13 = vld [vmem:[%s110_s0 + $0x18] sm:$0xff] }
   0x5   :  { %v30_v11 = vadd.f32 %v26_v2, %v22_v3  ;;  %v21_v14 = vld [vmem:[%s111_s1 + $0x18] sm:$0xff]  ;;  %v31_v16 = vadd.f32 %v27_v6, %v23_v7  ;;  %v32_v18 = vadd.f32 %v28_v10, %v24_v12 }
   0x6   :  { %v29_v15 = vld [vmem:[%s112_s2 + $0x18] sm:$0xff]  ;;  %v25_v17 = vmul.f32 %v21_v14, %v17_v13 }
   0x7   :  { %34 = vst [vmem:[%s113_s3] sm:$0xff] %v30_v11  ;;  %35 = vst [vmem:[%s113_s3 + $0x8] sm:$0xff] %v31_v16 }
   0x8   :  { %v33_v19 = vadd.f32 %v29_v15, %v25_v17  ;;  %36 = vst [vmem:[%s113_s3 + $0x10] sm:$0xff] %v32_v18 }
   0xa   :  { %37 = vst [vmem:[%s113_s3 + $0x18] sm:$0xff] %v33_v19 }

// kernel: conv2d_batchnorm.2
= control target key start
LH: loop header
LB: loop body
LE: loop exit
PB: predicated region body
PF: predicated region fallthrough
CT: control target
= control target key end

     0   :  { %v265_v1 = vmov 0   ;;  %vm80_vm0 = vcmask 1041408   ;;  %vm76_vm1 = vcmask 293888   ;;  %s360_s1 = inlined_call_operand.vmem [shape: bf16[36,512], index: 1, kind: input, shape index: {}]   ;;  %s361_s0 = inlined_call_operand.vmem [shape: bf16[8,36], index: 0, kind: input, shape index: {}]   ;;  %s362_s2 = inlined_call_operand.vmem [shape: f32[8,512], index: 2, kind: output, shape index: {0}]   ;;  %s363_s3 = inlined_call_operand.vmem [shape: f32[8,512], index: 3, kind: output, shape index: {1}]   ;;  %s364_s4 = inlined_call_operand.vmem [shape: f32[8,512], index: 4, kind: output, shape index: {2}]  }
   0x1   :  { %v249_v0 = vld [vmem:[%s360_s1 + $0x4] ss:$16 sps:$4 sm:$0xff]   ;;  %125 = vmatprep.mubr.bf16.mxu0 %v265_v1  ;;  %166 = vmatprep.mubr.bf16.mxu1 %v265_v1  ;;  %v251_v2 = vld [vmem:[%s360_s1 + $0xc] ss:$16 sps:$4 sm:$0xff]   ;;  %v253_v3 = vld [vmem:[%s360_s1] ss:$16 sps:$4 sm:$0xff]  }
   0x2   :  { %93 = vmatprep.subr.bf16.mxu0 %v249_v0  ;;  %v254_v4 = vld [vmem:[%s360_s1 + $0x8] ss:$16 sps:$4 sm:$0xff]   ;;  %134 = vmatprep.subr.bf16.mxu1 %v251_v2  ;;  %v255_v5 = vld [vmem:[%s360_s1 + $0x24] ss:$16 sps:$4 sm:$0xff]   ;;  %v257_v6 = vld [vmem:[%s360_s1 + $0x2c] ss:$16 sps:$4 sm:$0xff]  }
   0x3   :  { %94 = vmatpush1.bf16.msra.mxu0 %v253_v3  ;;  %135 = vmatpush1.bf16.msra.mxu1 %v254_v4  ;;  %v259_v7 = vld [vmem:[%s360_s1 + $0x20] ss:$16 sps:$4 sm:$0xff]   ;;  %v260_v8 = vld [vmem:[%s360_s1 + $0x28] ss:$16 sps:$4 sm:$0xff]  }
   0x4   :  { %95 = vmatprep.subr.bf16.mxu0 %v255_v5  ;;  %v24_v9 = vld [vmem:[%s360_s1 + $0x40] sm:$0x33]  ;;  %v25_v10 = vld [vmem:[%s360_s1 + $0x48] sm:$0x33]  ;;  %136 = vmatprep.subr.bf16.mxu1 %v257_v6 }
   0x5   :  { %v240_v11 = vcombine.high %v24_v9, %v24_v9  ;;  %v242_v12 = vcombine.high %v25_v10, %v25_v10  ;;  %v239_v13 = vcombine.low %v24_v9, %v24_v9  ;;  %v241_v14 = vcombine.low %v25_v10, %v25_v10  ;;  %v15_v17 = vld [vmem:[%s361_s0] sm:$0xf] }
   0x7   :  { %96 = vmatpush1.bf16.msra.mxu0 %v259_v7  ;;  %137 = vmatpush1.bf16.msra.mxu1 %v260_v8  ;;  %v82_v15 = vsel %vm80_vm0, %v239_v13, 0  ;;  %v88_v16 = vsel %vm80_vm0, %v241_v14, 0 }
   0x8   :  { %243 = vmatprep.subr.msk.bf16.mxu0 %vm80_vm0, %v240_v11  ;;  %245 = vmatprep.subr.msk.bf16.mxu1 %vm80_vm0, %v242_v12 }
   0xb   :  { %98 = vmatpush1.bf16.msra.mxu0 %v82_v15  ;;  %139 = vmatpush1.bf16.msra.mxu1 %v88_v16 }
   0xe   :  { %244 = vmatmul.mubr.msk.bf16.vlgmr.msra.gmra.mrb[0].mxu0 %vm76_vm1, %v15_v17  ;;  %246 = vmatmul.mubr.msk.bf16.vlgmr.msra.gmra.mrb[0].mxu1 %vm76_vm1, %v15_v17 }
  0xe1   :  { %v127_v18 = vpop.f32.mrb[0].mxu0  ;;  %v168_v19 = vpop.f32.mrb[0].mxu1 }
  0xe2   :  { %175 = vst [vmem:[%s362_s2] sm:$0xff] %v127_v18  ;;  %v207_v20 = vmul.f32 %v127_v18, %v127_v18  ;;  %177 = vst [vmem:[%s362_s2 + $0x10] sm:$0xff] %v168_v19  ;;  %v209_v21 = vmul.f32 %v168_v19, %v168_v19  ;;  %v129_v22 = vpop.f32.mrb[1].mxu0  ;;  %v170_v23 = vpop.f32.mrb[1].mxu1 }
  0xe3   :  { %176 = vst [vmem:[%s362_s2 + $0x8] sm:$0xff] %v129_v22  ;;  %v208_v24 = vmul.f32 %v129_v22, %v129_v22  ;;  %178 = vst [vmem:[%s362_s2 + $0x18] sm:$0xff] %v170_v23  ;;  %v210_v25 = vmul.f32 %v170_v23, %v170_v23  ;;  %v131_v26 = vpop.f32.mrb[2].mxu0  ;;  %v172_v27 = vpop.f32.mrb[2].mxu1 }
  0xe4   :  { %199 = vst [vmem:[%s363_s3] sm:$0xff] %v127_v18  ;;  %201 = vst [vmem:[%s363_s3 + $0x10] sm:$0xff] %v168_v19  ;;  %v132_v28 = vpop.f32.mrb[3].mxu0  ;;  %v173_v29 = vpop.f32.mrb[3].mxu1 }
  0xe5   :  { %200 = vst [vmem:[%s363_s3 + $0x8] sm:$0xff] %v129_v22  ;;  %202 = vst [vmem:[%s363_s3 + $0x18] sm:$0xff] %v170_v23 }
  0xe6   :  { %215 = vst [vmem:[%s364_s4] sm:$0xff] %v207_v20  ;;  %217 = vst [vmem:[%s364_s4 + $0x10] sm:$0xff] %v209_v21 }
  0xe7   :  { %216 = vst [vmem:[%s364_s4 + $0x8] sm:$0xff] %v208_v24  ;;  %218 = vst [vmem:[%s364_s4 + $0x18] sm:$0xff] %v210_v25 }

</bundles_post_ra>
